<compile_context>
chip_gen: v7x
topology: tpu7x:2x2x1
jax: 0.10.0
libtpu: 0.0.40
codegen_flags: <defaults>
</compile_context>

<pallas_src>
import jax
import jax.numpy as jnp
from jax.experimental import pallas as pl
from jax.experimental.pallas import tpu as pltpu

STATE_SIZE = 4                      # 2 + 2, as in the module
HIDDEN = 64
NUM_ACTIONS = 4                     # env_params['num_actions'] for this synthetic setup
OUT_WIDTH = NUM_ACTIONS * STATE_SIZE


def dynamics_kernel(a_ref, s_ref, wp1_ref, wp2_ref, wp3_ref, out_ref):
    # Whole per-tile problem lives in VMEM. wpN packs [W (in,out); b (1,out)].
    s = s_ref[...]                                        # (TB, 4) f32
    wp1 = wp1_ref[...]                                    # (5, 64)
    wp2 = wp2_ref[...]                                    # (65, 64)
    wp3 = wp3_ref[...]                                    # (65, 16)

    h1 = jnp.dot(s, wp1[:STATE_SIZE, :],
                 preferred_element_type=jnp.float32) + wp1[STATE_SIZE:, :]
    h1 = jnp.maximum(h1, 0.0)                             # (TB, 64)
    h2 = jnp.dot(h1, wp2[:HIDDEN, :],
                 preferred_element_type=jnp.float32) + wp2[HIDDEN:, :]
    h2 = jnp.maximum(h2, 0.0)                             # (TB, 64)
    x = jnp.dot(h2, wp3[:HIDDEN, :],
                preferred_element_type=jnp.float32) + wp3[HIDDEN:, :]
    # x: (TB, NUM_ACTIONS * STATE_SIZE)

    # torch.gather(x, 1, a*S + arange(S)) as a static-slice select chain:
    # 3 static slices + 3 vselects, all (TB, S) 2-D VPU work.
    # Assumes a[b] in [0, NUM_ACTIONS) (out-of-range falls back to action 0's slice).
    a = a_ref[...]                                        # (TB, 1) int32
    out = x[:, 0:STATE_SIZE]
    for k in range(1, NUM_ACTIONS):
        out = jnp.where(a == k, x[:, k * STATE_SIZE:(k + 1) * STATE_SIZE], out)
    out_ref[...] = out


def dynamics_forward(s, a, params, *, batch_tile=512):
    """s: (B, STATE_SIZE) f32, a: (B,) int action ids. Returns (B, STATE_SIZE) f32."""
    B = s.shape[0]
    w1, b1, w2, b2, w3, b3 = params

    # Fold each bias in as an extra row of its (in, out) weight -> one operand
    # (one micro-DMA) per layer instead of two.
    wp1 = jnp.concatenate([w1, b1.reshape(1, HIDDEN)], axis=0)      # (5, 64)
    wp2 = jnp.concatenate([w2, b2.reshape(1, HIDDEN)], axis=0)      # (65, 64)
    wp3 = jnp.concatenate([w3, b3.reshape(1, OUT_WIDTH)], axis=0)   # (65, 16)

    # Batch tile: multiple of 8 (sublane), capped (default 512 rows -> a few
    # hundred KiB of activations, trivially within v7x's 32 MiB scoped VMEM).
    TB = max(8, (min(batch_tile, B) // 8) * 8)
    nb = pl.cdiv(B, TB)
    B_pad = nb * TB
    if B_pad != B:
        s = jnp.pad(s, ((0, B_pad - B), (0, 0)))
        a = jnp.pad(a, ((0, B_pad - B),))
    a2d = a.astype(jnp.int32).reshape(B_pad, 1)

    out = pl.pallas_call(
        dynamics_kernel,
        out_shape=jax.ShapeDtypeStruct((B_pad, STATE_SIZE), jnp.float32),
        grid=(nb,),
        in_specs=[
            pl.BlockSpec((TB, 1), lambda i: (i, 0)),            # actions
            pl.BlockSpec((TB, STATE_SIZE), lambda i: (i, 0)),   # states
            pl.BlockSpec(wp1.shape, lambda i: (0, 0)),          # weights stay resident
            pl.BlockSpec(wp2.shape, lambda i: (0, 0)),
            pl.BlockSpec(wp3.shape, lambda i: (0, 0)),
        ],
        out_specs=pl.BlockSpec((TB, STATE_SIZE), lambda i: (i, 0)),
        compiler_params=pltpu.CompilerParams(
            dimension_semantics=("parallel",)),                 # batch axis: megacore/v7x 2-TC shardable
    )(a2d, s, wp1, wp2, wp3)
    return out[:B]


def init_params(key):
    """Module-faithful synthetic init. state_out (w3/b3) is zero, as in the module."""
    k1, k2, k3, k4 = jax.random.split(key, 4)
    # PyTorch Linear default: U(-1/sqrt(fan_in), 1/sqrt(fan_in)).
    lim1 = 1.0 / jnp.sqrt(STATE_SIZE)
    lim2 = 1.0 / jnp.sqrt(HIDDEN)
    # Stored pre-transposed as (in, out) so the kernel computes plain `act @ W`.
    w1 = jax.random.uniform(k1, (STATE_SIZE, HIDDEN), jnp.float32, -lim1, lim1)
    b1 = jax.random.uniform(k2, (1, HIDDEN), jnp.float32, -lim1, lim1)
    w2 = jax.random.uniform(k3, (HIDDEN, HIDDEN), jnp.float32, -lim2, lim2)
    b2 = jax.random.uniform(k4, (1, HIDDEN), jnp.float32, -lim2, lim2)
    w3 = jnp.zeros((HIDDEN, OUT_WIDTH), jnp.float32)
    b3 = jnp.zeros((1, OUT_WIDTH), jnp.float32)
    return (w1, b1, w2, b2, w3, b3)


def reference_forward(s, a, params):
    """Pure-JAX reference mirroring the PyTorch module exactly."""
    w1, b1, w2, b2, w3, b3 = params
    x = jnp.maximum(s @ w1 + b1, 0.0)
    x = jnp.maximum(x @ w2 + b2, 0.0)
    x = x @ w3 + b3
    idx = a[:, None].astype(jnp.int32) * STATE_SIZE + jnp.arange(STATE_SIZE)[None, :]
    return jnp.take_along_axis(x, idx, axis=1)


if __name__ == "__main__":
    key = jax.random.PRNGKey(0)
    kp, ks, ka, kw, kb = jax.random.split(key, 5)

    B = 8
    s = jax.random.normal(ks, (B, STATE_SIZE), jnp.float32)
    a = jax.random.randint(ka, (B,), 0, NUM_ACTIONS, jnp.int32)

    # 1) Module-faithful params (state_out zero-initialized, exactly as the spec).
    params = init_params(kp)
    out = jax.block_until_ready(dynamics_forward(s, a, params))
    ref = reference_forward(s, a, params)
    assert out.shape == (B, STATE_SIZE)
    assert jnp.allclose(out, ref, atol=1e-5, rtol=1e-5)

    # 2) Same network with a non-zero head so the action-indexed gather path is
    #    actually validated (with the zero head every output is 0).
    w1, b1, w2, b2, _, _ = params
    w3 = 0.1 * jax.random.normal(kw, (HIDDEN, OUT_WIDTH), jnp.float32)
    b3 = 0.1 * jax.random.normal(kb, (1, OUT_WIDTH), jnp.float32)
    params_rand = (w1, b1, w2, b2, w3, b3)
    out2 = jax.block_until_ready(dynamics_forward(s, a, params_rand))
    ref2 = reference_forward(s, a, params_rand)
    assert jnp.allclose(out2, ref2, atol=1e-5, rtol=1e-5)

    print("KERNEL_OK")
</pallas_src>

<mosaic_0001>
module attributes {stable_mosaic.version = 11 : i64} {
  func.func @dynamics_kernel(%arg0: i32, %arg1: memref<8x1xi32, #tpu.memory_space<vmem>>, %arg2: memref<8x4xf32, #tpu.memory_space<vmem>>, %arg3: memref<5x64xf32, #tpu.memory_space<vmem>>, %arg4: memref<65x64xf32, #tpu.memory_space<vmem>>, %arg5: memref<65x16xf32, #tpu.memory_space<vmem>>, %arg6: memref<8x4xf32, #tpu.memory_space<vmem>>) attributes {dimension_semantics = [#tpu.dimension_semantics<parallel>], iteration_bounds = array<i64: 1>, scalar_prefetch = 0 : i64, scratch_operands = 0 : i64, tpu.core_type = #tpu.core_type<tc>, window_params = [{transform_indices = @transform_0, window_bounds = array<i64: 8, 1>}, {transform_indices = @transform_1, window_bounds = array<i64: 8, 4>}, {pipeline_mode = #tpu.pipeline_mode<synchronous>, transform_indices = @transform_2, window_bounds = array<i64: 5, 64>}, {pipeline_mode = #tpu.pipeline_mode<synchronous>, transform_indices = @transform_3, window_bounds = array<i64: 65, 64>}, {pipeline_mode = #tpu.pipeline_mode<synchronous>, transform_indices = @transform_4, window_bounds = array<i64: 65, 16>}, {transform_indices = @transform_5, window_bounds = array<i64: 8, 4>}]} {
    %c0 = arith.constant 0 : index
    %c0_0 = arith.constant 0 : index
    %0 = vector.load %arg2[%c0, %c0_0] : memref<8x4xf32, #tpu.memory_space<vmem>>, vector<8x4xf32>
    %c0_1 = arith.constant 0 : index
    %c0_2 = arith.constant 0 : index
    %1 = vector.load %arg3[%c0_1, %c0_2] : memref<5x64xf32, #tpu.memory_space<vmem>>, vector<5x64xf32>
    %c0_3 = arith.constant 0 : index
    %c0_4 = arith.constant 0 : index
    %2 = vector.load %arg4[%c0_3, %c0_4] : memref<65x64xf32, #tpu.memory_space<vmem>>, vector<65x64xf32>
    %c0_5 = arith.constant 0 : index
    %c0_6 = arith.constant 0 : index
    %3 = vector.load %arg5[%c0_5, %c0_6] : memref<65x16xf32, #tpu.memory_space<vmem>>, vector<65x16xf32>
    %4 = vector.extract_strided_slice %1 {offsets = [0, 0], sizes = [4, 64], strides = [1, 1]} : vector<5x64xf32> to vector<4x64xf32>
    %cst = arith.constant dense<0.000000e+00> : vector<8x64xf32>
    %5 = tpu.matmul %0, %4, %cst {dimension_numbers = #tpu.dot_dimension_numbers<[1], [0], [0], [1], [0, 0, 1, 1], [], []>} : vector<8x4xf32>, vector<4x64xf32>, vector<8x64xf32> -> vector<8x64xf32>
    %6 = vector.extract_strided_slice %1 {offsets = [4, 0], sizes = [1, 64], strides = [1, 1]} : vector<5x64xf32> to vector<1x64xf32>
    %7 = vector.broadcast %6 : vector<1x64xf32> to vector<8x64xf32>
    %8 = arith.addf %5, %7 : vector<8x64xf32>
    %cst_7 = arith.constant 0.000000e+00 : f32
    %9 = vector.broadcast %cst_7 : f32 to vector<8x64xf32>
    %10 = arith.maximumf %8, %9 : vector<8x64xf32>
    %11 = vector.extract_strided_slice %2 {offsets = [0, 0], sizes = [64, 64], strides = [1, 1]} : vector<65x64xf32> to vector<64x64xf32>
    %cst_8 = arith.constant dense<0.000000e+00> : vector<8x64xf32>
    %12 = tpu.matmul %10, %11, %cst_8 {dimension_numbers = #tpu.dot_dimension_numbers<[1], [0], [0], [1], [0, 0, 1, 1], [], []>} : vector<8x64xf32>, vector<64x64xf32>, vector<8x64xf32> -> vector<8x64xf32>
    %13 = vector.extract_strided_slice %2 {offsets = [64, 0], sizes = [1, 64], strides = [1, 1]} : vector<65x64xf32> to vector<1x64xf32>
    %14 = vector.broadcast %13 : vector<1x64xf32> to vector<8x64xf32>
    %15 = arith.addf %12, %14 : vector<8x64xf32>
    %cst_9 = arith.constant 0.000000e+00 : f32
    %16 = vector.broadcast %cst_9 : f32 to vector<8x64xf32>
    %17 = arith.maximumf %15, %16 : vector<8x64xf32>
    %18 = vector.extract_strided_slice %3 {offsets = [0, 0], sizes = [64, 16], strides = [1, 1]} : vector<65x16xf32> to vector<64x16xf32>
    %cst_10 = arith.constant dense<0.000000e+00> : vector<8x16xf32>
    %19 = tpu.matmul %17, %18, %cst_10 {dimension_numbers = #tpu.dot_dimension_numbers<[1], [0], [0], [1], [0, 0, 1, 1], [], []>} : vector<8x64xf32>, vector<64x16xf32>, vector<8x16xf32> -> vector<8x16xf32>
    %20 = vector.extract_strided_slice %3 {offsets = [64, 0], sizes = [1, 16], strides = [1, 1]} : vector<65x16xf32> to vector<1x16xf32>
    %21 = vector.broadcast %20 : vector<1x16xf32> to vector<8x16xf32>
    %22 = arith.addf %19, %21 : vector<8x16xf32>
    %c0_11 = arith.constant 0 : index
    %c0_12 = arith.constant 0 : index
    %23 = vector.load %arg1[%c0_11, %c0_12] : memref<8x1xi32, #tpu.memory_space<vmem>>, vector<8x1xi32>
    %24 = vector.extract_strided_slice %22 {offsets = [0, 0], sizes = [8, 4], strides = [1, 1]} : vector<8x16xf32> to vector<8x4xf32>
    %c1_i32 = arith.constant 1 : i32
    %25 = vector.broadcast %c1_i32 : i32 to vector<8x1xi32>
    %26 = arith.cmpi eq, %23, %25 : vector<8x1xi32>
    %27 = vector.extract_strided_slice %22 {offsets = [0, 4], sizes = [8, 4], strides = [1, 1]} : vector<8x16xf32> to vector<8x4xf32>
    %28 = vector.shape_cast %26 : vector<8x1xi1> to vector<8x1xi1>
    %29 = vector.broadcast %28 : vector<8x1xi1> to vector<8x4xi1>
    %30 = arith.select %29, %27, %24 : vector<8x4xi1>, vector<8x4xf32>
    %c2_i32 = arith.constant 2 : i32
    %31 = vector.broadcast %c2_i32 : i32 to vector<8x1xi32>
    %32 = arith.cmpi eq, %23, %31 : vector<8x1xi32>
    %33 = vector.extract_strided_slice %22 {offsets = [0, 8], sizes = [8, 4], strides = [1, 1]} : vector<8x16xf32> to vector<8x4xf32>
    %34 = vector.shape_cast %32 : vector<8x1xi1> to vector<8x1xi1>
    %35 = vector.broadcast %34 : vector<8x1xi1> to vector<8x4xi1>
    %36 = arith.select %35, %33, %30 : vector<8x4xi1>, vector<8x4xf32>
    %c3_i32 = arith.constant 3 : i32
    %37 = vector.broadcast %c3_i32 : i32 to vector<8x1xi32>
    %38 = arith.cmpi eq, %23, %37 : vector<8x1xi32>
    %39 = vector.extract_strided_slice %22 {offsets = [0, 12], sizes = [8, 4], strides = [1, 1]} : vector<8x16xf32> to vector<8x4xf32>
    %40 = vector.shape_cast %38 : vector<8x1xi1> to vector<8x1xi1>
    %41 = vector.broadcast %40 : vector<8x1xi1> to vector<8x4xi1>
    %42 = arith.select %41, %39, %36 : vector<8x4xi1>, vector<8x4xf32>
    %c0_13 = arith.constant 0 : index
    %c0_14 = arith.constant 0 : index
    %43 = vector.load %arg6[%c0_13, %c0_14] : memref<8x4xf32, #tpu.memory_space<vmem>>, vector<8x4xf32>
    tpu.vector_store %arg6[%c0_13, %c0_14], %42 {strides = array<i32>} : memref<8x4xf32, #tpu.memory_space<vmem>>, vector<8x4xf32>,
    return
  }
  func.func @transform_0(%arg0: i32) -> (i32, i32) {
    %c0_i32 = arith.constant 0 : i32
    %c0_i32_0 = arith.constant 0 : i32
    return %arg0, %c0_i32 : i32, i32
  }
  func.func @transform_1(%arg0: i32) -> (i32, i32) {
    %c0_i32 = arith.constant 0 : i32
    %c0_i32_0 = arith.constant 0 : i32
    return %arg0, %c0_i32 : i32, i32
  }
  func.func @transform_2(%arg0: i32) -> (i32, i32) {
    %c0_i32 = arith.constant 0 : i32
    %c0_i32_0 = arith.constant 0 : i32
    %c0_i32_1 = arith.constant 0 : i32
    return %c0_i32, %c0_i32_0 : i32, i32
  }
  func.func @transform_3(%arg0: i32) -> (i32, i32) {
    %c0_i32 = arith.constant 0 : i32
    %c0_i32_0 = arith.constant 0 : i32
    %c0_i32_1 = arith.constant 0 : i32
    return %c0_i32, %c0_i32_0 : i32, i32
  }
  func.func @transform_4(%arg0: i32) -> (i32, i32) {
    %c0_i32 = arith.constant 0 : i32
    %c0_i32_0 = arith.constant 0 : i32
    %c0_i32_1 = arith.constant 0 : i32
    return %c0_i32, %c0_i32_0 : i32, i32
  }
  func.func @transform_5(%arg0: i32) -> (i32, i32) {
    %c0_i32 = arith.constant 0 : i32
    %c0_i32_0 = arith.constant 0 : i32
    return %arg0, %c0_i32 : i32, i32
  }
}

</mosaic_0001>

<bundles_post_ra>
// kernel: tpu_custom_call.1
= control target key start
LH: loop header
LB: loop body
LE: loop exit
PB: predicated region body
PF: predicated region fallthrough
CT: control target
= control target key end

     0   :  { %vm48_vm0 = vcmask 1043456   ;;  %vm44_vm1 = vcmask 31744   ;;  %v423_v0 = vmov 0.0   ;;  %vm424_vm2 = vmmov 0   ;;  %s529_s2 = inlined_call_operand.vmem [shape: f32[5,64], index: 2, kind: input, shape index: {}]   ;;  %s530_s1 = inlined_call_operand.vmem [shape: f32[8,4], index: 1, kind: input, shape index: {}]   ;;  %s531_s3 = inlined_call_operand.vmem [shape: f32[65,64], index: 3, kind: input, shape index: {}]   ;;  %s532_s4 = inlined_call_operand.vmem [shape: f32[65,16], index: 4, kind: input, shape index: {}]   ;;  %s533_s0 = inlined_call_operand.vmem [shape: s32[8,1], index: 0, kind: input, shape index: {}]   ;;  %s534_s5 = inlined_call_operand.vmem [shape: f32[8,4], index: 5, kind: output, shape index: {}]  }
   0x1   :  { %348 = vmatprep.subr.mxu0 %v423_v0  ;;  %v21_v1 = vld [vmem:[%s529_s2] sm:$0x1f]  ;;  %350 = vmatprep.mubr.msk.f32.mxu0 %vm424_vm2, %v423_v0  ;;  %v425_v4 = vmov 0.0|0.0   ;;  %v23_v5 = vld [vmem:[%s531_s3 + $0x8] sm:$0xff]  ;;  %v24_v6 = vld [vmem:[%s531_s3 + $0x10] sm:$0xff]  ;;  %v40_v25 = vlaneseq  ;;  %vm127_vm3 = vcmask 523264  }
   0x2   :  { %v20_v2 = vld [vmem:[%s530_s1] sm:$0xff]  ;;  %349 = vmatpush3.msk.msra.mxu0 %vm48_vm0, %v21_v1  ;;  %391 = vmatprep.subr.bf16.mxu1 %v425_v4  ;;  %v25_v7 = vld [vmem:[%s531_s3 + $0x18] sm:$0xff]  ;;  %v27_v11 = vld [vmem:[%s531_s3 + $0x28] sm:$0xff]  ;;  %v426_v36 = vmov 0  }
   0x3   :  { %v22_v3 = vld [vmem:[%s531_s3] sm:$0xff]  ;;  %351 = vmatmul.mubr.msk.f32.vlgmr.msra.gmra.mrb[0].mxu0 %vm44_vm1, %v20_v2  ;;  %369 = vmatprep.mubr.msk.f32.mxu1 %vm424_vm2, %v423_v0  ;;  %v395_v9 = vpack.c.bf16 %v25_v7, %v24_v6  ;;  %v28_v13 = vld [vmem:[%s531_s3 + $0x30] sm:$0xff]  ;;  %v29_v14 = vld [vmem:[%s531_s3 + $0x38] sm:$0xff]  ;;  %v41_v26 = vshrl.u32 %v40_v25, 7 }
   0x4   :  { %v392_v8 = vpack.c.bf16 %v23_v5, %v22_v3  ;;  %403 = vmatprep.subr.bf16.mxu0 %v425_v4  ;;  %388 = vmatprep.mubr.msk.f32.mxu0 %vm424_vm2, %v423_v0  ;;  %v26_v10 = vld [vmem:[%s531_s3 + $0x20] sm:$0xff]  ;;  %v401_v15 = vpack.c.bf16 %v29_v14, %v28_v13  ;;  %v32_v17 = vld [vmem:[%s532_s4 + $0x8] sm:$0xff]  ;;  %v33_v18 = vld [vmem:[%s532_s4 + $0x10] sm:$0xff] }
   0x5   :  { %v398_v12 = vpack.c.bf16 %v27_v11, %v26_v10  ;;  %v31_v16 = vld [vmem:[%s532_s4] sm:$0xff]  ;;  %v34_v20 = vld [vmem:[%s532_s4 + $0x18] sm:$0xff]  ;;  %v36_v23 = vld [vmem:[%s532_s4 + $0x28] sm:$0xff]  ;;  %v42_v27 = vsub.s32 4, %v41_v26  ;;  %421 = vset.pattern.permute.xlu0 %v426_v36  ;;  %422 = vset.pattern.permute.xlu1 %v426_v36 }
   0x6   :  { %393 = vmatpush3.bf16.msra.mxu1 %v392_v8  ;;  %v404_v19 = vpack.c.bf16 %v32_v17, %v31_v16  ;;  %v407_v21 = vpack.c.bf16 %v34_v20, %v33_v18  ;;  %v35_v22 = vld [vmem:[%s532_s4 + $0x20] sm:$0xff]  ;;  %v37_v33 = vld [vmem:[%s532_s4 + $0x30] sm:$0xff]  ;;  %v38_v34 = vld [vmem:[%s532_s4 + $0x38] sm:$0xff] }
   0x7   :  { %394 = vmatprep.subr.bf16.mxu1 %v425_v4  ;;  %v410_v24 = vpack.c.bf16 %v36_v23, %v35_v22  ;;  %v43_v28 = vrot.slane %v21_v1, %v42_v27  ;;  %v413_v35 = vpack.c.bf16 %v38_v34, %v37_v33  ;;  %v279_v37 = vld [vmem:[%s533_s0] sm:$0xff]  ;;  %s427_s0 = smov 4  }
   0x8   :  { %405 = vmatpush3.bf16.msra.mxu0 %v404_v19  ;;  %vm280_vm4 = vcmp.eq.s32.totalorder %v279_v37, 1  ;;  %v324_v39 = vld [vmem:[%s531_s3 + $0x40] ss:$0 sm:$0xff]  ;;  %vm291_vm5 = vcmp.eq.s32.totalorder %v279_v37, 2  ;;  %vm302_vm6 = vcmp.eq.s32.totalorder %v279_v37, 3  ;;  %s428_s3 = smov 116  }
   0x9   :  { %406 = vmatprep.subr.bf16.mxu0 %v425_v4  ;;  %v281_v38 = vsel %vm280_vm4, 1, %v426_v36  ;;  %v292_v44 = vsel %vm291_vm5, 1, %v426_v36  ;;  %v326_v45 = vld [vmem:[%s532_s4 + $0x40] ss:$0 sm:$0xff]  ;;  %v303_v49 = vsel %vm302_vm6, 1, %v426_v36 }
   0xa   :  { %396 = vmatpush3.bf16.msra.mxu1 %v395_v9  ;;  %283 = vperm.xlu0 %421, %v281_v38  }
   0xb   :  { %397 = vmatprep.subr.bf16.mxu1 %v425_v4  ;;  %294 = vperm.xlu1 %422, %v292_v44  }
   0xc   :  { %408 = vmatpush3.bf16.msra.mxu0 %v407_v21 }
   0xd   :  { %409 = vmatprep.subr.bf16.mxu0 %v425_v4 }
   0xe   :  { %399 = vmatpush3.bf16.msra.mxu1 %v398_v12 }
   0xf   :  { %400 = vmatprep.subr.bf16.mxu1 %v425_v4 }
  0x10   :  { %411 = vmatpush3.bf16.msra.mxu0 %v410_v24 }
  0x11   :  { %412 = vmatprep.subr.bf16.mxu0 %v425_v4 }
  0x12   :  { %402 = vmatpush3.bf16.msra.mxu1 %v401_v15 }
  0x14   :  { %414 = vmatpush3.bf16.msra.mxu0 %v413_v35 }
  0x89   :  { %v284_v50 = vpop.permute.xlu0 %283 }
  0x8a   :  { %vm285_vm7 = vcmp.eq.s32.totalorder %v284_v50, 1  ;;  %v295_v53 = vpop.permute.xlu1 %294 }
  0x8b   :  { %vm296_vm8 = vcmp.eq.s32.totalorder %v295_v53, 1 }
  0xd6   :  { %v118_v29 = vpop.f32.mrb[0].mxu0 }
  0xd7   :  { %v119_v30 = vadd.f32 %v118_v29, %v43_v28  ;;  %v352_v31 = vpop.f32.mrb[1].mxu0 }
  0xd9   :  { %v122_v32 = vmax.f32 %v119_v30, 0.0 }
  0xdb   :  { %370 = vmatmul.mubr.msk.f32.vlgmr.msra.gmra.mrb[0].mxu1 %vm127_vm3, %v122_v32 }
 0x1ae   :  { %v197_v40 = vpop.f32.mrb[0].mxu1 }
 0x1af   :  { %v198_v41 = vadd.f32 %v324_v39, %v197_v40  ;;  %v371_v42 = vpop.f32.mrb[1].mxu1 }
 0x1b1   :  { %v201_v43 = vmax.f32 %v198_v41, 0.0 }
 0x1b3   :  { %389 = vmatmul.mubr.msk.f32.vlgmr.msra.gmra.mrb[2].mxu0 %vm127_vm3, %v201_v43 }
 0x286   :  { %v275_v46 = vpop.f32.mrb[2].mxu0 }
 0x287   :  { %v276_v47 = vadd.f32 %v326_v45, %v275_v46  ;;  %v390_v48 = vpop.f32.mrb[3].mxu0 }
 0x289   :  { %287 = vrot.lane.b32.xlu0 %v276_v47, %s427_s0 }
 0x28d   :  { %305 = vperm.xlu0 %421, %v303_v49  }
 0x2fb   :  { %v288_v51 = vpop.permute.xlu0 %287 }
 0x2fc   :  { %v290_v52 = vsel %vm285_vm7, %v276_v47, %v288_v51 }
 0x2fd   :  { %298 = vrot.lane.b32.xlu1 %v290_v52, %s427_s0 }
 0x30c   :  { %v306_v56 = vpop.permute.xlu0 %305 }
 0x30d   :  { %vm307_vm9 = vcmp.eq.s32.totalorder %v306_v56, 1 }
 0x36f   :  { %v299_v54 = vpop.permute.xlu1 %298 }
 0x370   :  { %v301_v55 = vsel %vm296_vm8, %v276_v47, %v299_v54 }
 0x371   :  { %309 = vrot.lane.b32.xlu1 %v301_v55, %s427_s0 }
 0x3e3   :  { %v310_v57 = vpop.permute.xlu1 %309 }
 0x3e4   :  { %v312_v58 = vsel %vm307_vm9, %v276_v47, %v310_v57 }
 0x3e5   :  { %314 = vrot.lane.b32.xlu0 %v312_v58, %s428_s3 }
 0x457   :  { %v315_v59 = vpop.permute.xlu0 %314 }
 0x458   :  { %317 = vst.msk [vmem:[%s534_s5] sm:$0xff] %vm44_vm1, %v315_v59 }

</bundles_post_ra>
